<compile_context>
chip_gen: v7x
topology: tpu7x:2x2x1
jax: 0.10.0
libtpu: 0.0.40
codegen_flags: <defaults>
</compile_context>

<pallas_src>
import functools

import jax
import jax.numpy as jnp
from jax.experimental import pallas as pl
from jax.experimental.pallas import tpu as pltpu


def _round_up(n, m):
    return ((n + m - 1) // m) * m


def _encoder_logsoftmax_kernel(x_ref, w_ref, b_ref, o_ref, acc_ref, *, valid_e):
    """One (B-tile, K-tile) grid step of log_softmax(x @ w + b, axis=-1).

    x_ref:   (tB, tk)    bf16 activation tile
    w_ref:   (tk, E_pad) bf16 weight tile
    b_ref:   (1,  E_pad) f32 bias (constant block index across the grid)
    o_ref:   (tB, E_pad) f32 output tile (resident across the K axis)
    acc_ref: (tB, E_pad) f32 VMEM accumulator scratch
    """
    k = pl.program_id(1)

    # Fold the bias add into the accumulator init (removes a per-step VPU add
    # and keeps the broadcast out of the per-k path).
    @pl.when(k == 0)
    def _init():
        acc_ref[...] = jnp.broadcast_to(
            b_ref[...].astype(jnp.float32), acc_ref.shape
        )

    # MXU matmul: bf16 operands, f32 accumulation.
    acc_ref[...] += jnp.dot(
        x_ref[...], w_ref[...], preferred_element_type=jnp.float32
    )

    # Finalize: masked, numerically stable log_softmax over the padded E axis.
    @pl.when(k == pl.num_programs(1) - 1)
    def _finalize():
        z = acc_ref[...]
        lane = jax.lax.broadcasted_iota(jnp.int32, z.shape, 1)
        z = jnp.where(lane < valid_e, z, -jnp.inf)  # exclude E-padding lanes
        m = jnp.max(z, axis=-1, keepdims=True)
        shifted = z - m
        lse = jnp.log(jnp.sum(jnp.exp(shifted), axis=-1, keepdims=True))
        o_ref[...] = (shifted - lse).astype(o_ref.dtype)


def multimodal_simple_position_forward(image, instructions, params):
    """Mirrors MultimodalSimplePositionModule.forward(image, instructions).

    `instructions` is accepted but unused, exactly as in the PyTorch forward
    (text_module is never invoked)."""
    del instructions
    w, b = params["img_w"], params["img_b"]  # (K, E), (E,)

    B = image.shape[0]
    K, E = w.shape
    x_flat = image.reshape(B, -1)  # flatten NCHW -> (B, K)
    assert x_flat.shape[1] == K, "image features must match encoder in_features"

    # ---- tile sizes ---------------------------------------------------------
    # B tile: 128 rows to fill the MXU M dimension when B is large; otherwise
    # the smallest multiple of 8 covering B (sublane granularity).
    tB = 128 if B >= 128 else _round_up(B, 8)
    # K tile: 512 (multiple of 128 so the x-block lane dim is dense) keeps
    # 2x(tB*tk + tk*E_pad) bf16 buffers far below even v7x's 32 MiB scoped VMEM.
    tk = min(512, _round_up(K, 128))
    E_pad = _round_up(E, 128)          # lane-dense output / reduces
    B_pad = _round_up(B, tB)
    K_pad = _round_up(K, tk)

    # ---- pad + cast operands (bf16 matmul operands, f32 bias) ---------------
    x_p = jnp.pad(x_flat.astype(jnp.bfloat16), ((0, B_pad - B), (0, K_pad - K)))
    w_p = jnp.pad(w.astype(jnp.bfloat16), ((0, K_pad - K), (0, E_pad - E)))
    b_p = jnp.pad(b.astype(jnp.float32), (0, E_pad - E)).reshape(1, E_pad)

    n_b = B_pad // tB
    n_k = K_pad // tk

    cost = pl.CostEstimate(
        flops=2 * B_pad * K_pad * E_pad,
        transcendentals=2 * B_pad * E_pad,
        bytes_accessed=(x_p.size * 2) + (n_b * w_p.size * 2)
        + (b_p.size * 4) + (B_pad * E_pad * 4),
    )

    out = pl.pallas_call(
        functools.partial(_encoder_logsoftmax_kernel, valid_e=E),
        out_shape=jax.ShapeDtypeStruct((B_pad, E_pad), jnp.float32),
        grid_spec=pltpu.PrefetchScalarGridSpec(
            num_scalar_prefetch=0,
            grid=(n_b, n_k),
            in_specs=[
                pl.BlockSpec((tB, tk), lambda i, k: (i, k)),      # activations
                pl.BlockSpec((tk, E_pad), lambda i, k: (k, 0)),   # weights
                pl.BlockSpec((1, E_pad), lambda i, k: (0, 0)),    # bias (const)
            ],
            out_specs=pl.BlockSpec((tB, E_pad), lambda i, k: (i, 0)),
            scratch_shapes=[pltpu.VMEM((tB, E_pad), jnp.float32)],
        ),
        compiler_params=pltpu.CompilerParams(
            dimension_semantics=("parallel", "arbitrary"),
        ),
        cost_estimate=cost,
    )(x_p, w_p, b_p)

    # Strip batch / embedding padding (padded lanes hold -inf by construction).
    return out[:B, :E]


def init_params(key, in_features, total_emb_size):
    """Deterministic synthetic parameters for the image encoder."""
    k_w, k_b = jax.random.split(key)
    w = jax.random.normal(k_w, (in_features, total_emb_size), jnp.float32) * 0.02
    b = jax.random.normal(k_b, (total_emb_size,), jnp.float32) * 0.02
    return {"img_w": w, "img_b": b}


if __name__ == "__main__":
    # Small shapes consistent with the module's forward.
    B, C, H, W = 2, 4, 16, 16          # image NCHW
    total_emb_size = 32                # image embedding size
    seq_len = 8                        # instructions (unused by forward)

    key = jax.random.PRNGKey(0)
    k_img, k_txt, k_param = jax.random.split(key, 3)

    image = jax.random.normal(k_img, (B, C, H, W), jnp.float32)
    instructions = jax.random.randint(k_txt, (B, seq_len), 0, 100)

    params = init_params(k_param, C * H * W, total_emb_size)

    out = multimodal_simple_position_forward(image, instructions, params)
    out = jax.block_until_ready(out)

    # Pure-JAX reference with the same bf16-operand / f32-accumulation recipe.
    x_flat = image.reshape(B, -1)
    z_ref = jnp.dot(
        x_flat.astype(jnp.bfloat16),
        params["img_w"].astype(jnp.bfloat16),
        preferred_element_type=jnp.float32,
    ) + params["img_b"].astype(jnp.float32)
    ref = jax.nn.log_softmax(z_ref, axis=-1)

    row_sums = jnp.sum(jnp.exp(out), axis=-1)
    assert out.shape == (B, total_emb_size)
    assert jnp.allclose(row_sums, jnp.ones_like(row_sums), atol=1e-5)
    assert jnp.allclose(out, ref, atol=1e-3, rtol=1e-3)

    # TODO(synk): dense1/dense_x/dense_y/dense_pose and text_module exist in
    # __init__ but are unused in forward(), so they are deliberately omitted.

    print("KERNEL_OK")
</pallas_src>

<mosaic_0001>
module attributes {stable_mosaic.version = 11 : i64} {
  func.func @_encoder_logsoftmax_kernel(%arg0: i32, %arg1: i32, %arg2: memref<8x512xbf16, #tpu.memory_space<vmem>>, %arg3: memref<512x128xbf16, #tpu.memory_space<vmem>>, %arg4: memref<1x128xf32, #tpu.memory_space<vmem>>, %arg5: memref<8x128xf32, #tpu.memory_space<vmem>>, %arg6: memref<8x128xf32, #tpu.memory_space<vmem>>) attributes {dimension_semantics = [#tpu.dimension_semantics<parallel>, #tpu.dimension_semantics<arbitrary>], iteration_bounds = array<i64: 1, 2>, scalar_prefetch = 0 : i64, scratch_operands = 1 : i64, tpu.core_type = #tpu.core_type<tc>, window_params = [{transform_indices = @transform_0, window_bounds = array<i64: 8, 512>}, {transform_indices = @transform_1, window_bounds = array<i64: 512, 128>}, {pipeline_mode = #tpu.pipeline_mode<synchronous>, transform_indices = @transform_2, window_bounds = array<i64: 1, 128>}, {transform_indices = @transform_3, window_bounds = array<i64: 8, 128>}]} {
    %c0_i32 = arith.constant 0 : i32
    %0 = arith.cmpi eq, %arg1, %c0_i32 : i32
    %1 = arith.extui %0 : i1 to i32
    %c0_i32_0 = arith.constant 0 : i32
    %2 = arith.cmpi ne, %1, %c0_i32_0 : i32
    scf.if %2 {
      %c0_9 = arith.constant 0 : index
      %c0_10 = arith.constant 0 : index
      %12 = vector.load %arg4[%c0_9, %c0_10] : memref<1x128xf32, #tpu.memory_space<vmem>>, vector<1x128xf32>
      %13 = vector.shape_cast %12 : vector<1x128xf32> to vector<1x128xf32>
      %14 = vector.broadcast %13 : vector<1x128xf32> to vector<8x128xf32>
      %c0_11 = arith.constant 0 : index
      %c0_12 = arith.constant 0 : index
      %15 = vector.load %arg6[%c0_11, %c0_12] : memref<8x128xf32, #tpu.memory_space<vmem>>, vector<8x128xf32>
      tpu.vector_store %arg6[%c0_11, %c0_12], %14 {strides = array<i32>} : memref<8x128xf32, #tpu.memory_space<vmem>>, vector<8x128xf32>,
    } else {
    }
    %c0 = arith.constant 0 : index
    %c0_1 = arith.constant 0 : index
    %3 = vector.load %arg6[%c0, %c0_1] : memref<8x128xf32, #tpu.memory_space<vmem>>, vector<8x128xf32>
    %c0_2 = arith.constant 0 : index
    %c0_3 = arith.constant 0 : index
    %4 = vector.load %arg2[%c0_2, %c0_3] : memref<8x512xbf16, #tpu.memory_space<vmem>>, vector<8x512xbf16>
    %c0_4 = arith.constant 0 : index
    %c0_5 = arith.constant 0 : index
    %5 = vector.load %arg3[%c0_4, %c0_5] : memref<512x128xbf16, #tpu.memory_space<vmem>>, vector<512x128xbf16>
    %cst = arith.constant dense<0.000000e+00> : vector<8x128xf32>
    %6 = tpu.matmul %4, %5, %cst {dimension_numbers = #tpu.dot_dimension_numbers<[1], [0], [0], [1], [0, 0, 1, 1], [], []>} : vector<8x512xbf16>, vector<512x128xbf16>, vector<8x128xf32> -> vector<8x128xf32>
    %7 = arith.addf %3, %6 : vector<8x128xf32>
    %c0_6 = arith.constant 0 : index
    %c0_7 = arith.constant 0 : index
    %8 = vector.load %arg6[%c0_6, %c0_7] : memref<8x128xf32, #tpu.memory_space<vmem>>, vector<8x128xf32>
    tpu.vector_store %arg6[%c0_6, %c0_7], %7 {strides = array<i32>} : memref<8x128xf32, #tpu.memory_space<vmem>>, vector<8x128xf32>,
    %c1_i32 = arith.constant 1 : i32
    %9 = arith.cmpi eq, %arg1, %c1_i32 : i32
    %10 = arith.extui %9 : i1 to i32
    %c0_i32_8 = arith.constant 0 : i32
    %11 = arith.cmpi ne, %10, %c0_i32_8 : i32
    scf.if %11 {
      %c0_9 = arith.constant 0 : index
      %c0_10 = arith.constant 0 : index
      %12 = vector.load %arg6[%c0_9, %c0_10] : memref<8x128xf32, #tpu.memory_space<vmem>>, vector<8x128xf32>
      %13 = tpu.iota {dimensions = array<i32: 1>} : vector<8x128xi32>
      %c32_i32 = arith.constant 32 : i32
      %14 = vector.broadcast %c32_i32 : i32 to vector<8x128xi32>
      %15 = arith.cmpi slt, %13, %14 : vector<8x128xi32>
      %cst_11 = arith.constant 0xFF800000 : f32
      %16 = vector.broadcast %cst_11 : f32 to vector<8x128xf32>
      %17 = arith.select %15, %12, %16 : vector<8x128xi1>, vector<8x128xf32>
      %cst_12 = arith.constant dense<0xFF800000> : vector<8xf32>
      %18 = vector.multi_reduction <maximumf>, %17, %cst_12 [1] : vector<8x128xf32> to vector<8xf32>
      %19 = vector.shape_cast %18 : vector<8xf32> to vector<8x1xf32>
      %20 = vector.broadcast %19 : vector<8x1xf32> to vector<8x128xf32>
      %21 = arith.subf %17, %20 : vector<8x128xf32>
      %22 = math.exp %21 : vector<8x128xf32>
      %cst_13 = arith.constant dense<0.000000e+00> : vector<8xf32>
      %23 = vector.multi_reduction <add>, %22, %cst_13 [1] : vector<8x128xf32> to vector<8xf32>
      %24 = vector.shape_cast %23 : vector<8xf32> to vector<8x1xf32>
      %25 = math.log %24 : vector<8x1xf32>
      %26 = vector.broadcast %25 : vector<8x1xf32> to vector<8x128xf32>
      %27 = arith.subf %21, %26 : vector<8x128xf32>
      %c0_14 = arith.constant 0 : index
      %c0_15 = arith.constant 0 : index
      %28 = vector.load %arg5[%c0_14, %c0_15] : memref<8x128xf32, #tpu.memory_space<vmem>>, vector<8x128xf32>
      tpu.vector_store %arg5[%c0_14, %c0_15], %27 {strides = array<i32>} : memref<8x128xf32, #tpu.memory_space<vmem>>, vector<8x128xf32>,
    } else {
    }
    return
  }
  func.func @transform_0(%arg0: i32, %arg1: i32) -> (i32, i32) {
    %c0_i32 = arith.constant 0 : i32
    return %arg0, %arg1 : i32, i32
  }
  func.func @transform_1(%arg0: i32, %arg1: i32) -> (i32, i32) {
    %c0_i32 = arith.constant 0 : i32
    %c0_i32_0 = arith.constant 0 : i32
    return %arg1, %c0_i32 : i32, i32
  }
  func.func @transform_2(%arg0: i32, %arg1: i32) -> (i32, i32) {
    %c0_i32 = arith.constant 0 : i32
    %c0_i32_0 = arith.constant 0 : i32
    %c0_i32_1 = arith.constant 0 : i32
    return %c0_i32, %c0_i32_0 : i32, i32
  }
  func.func @transform_3(%arg0: i32, %arg1: i32) -> (i32, i32) {
    %c0_i32 = arith.constant 0 : i32
    %c0_i32_0 = arith.constant 0 : i32
    return %arg0, %c0_i32 : i32, i32
  }
}

</mosaic_0001>

<bundles_post_ra>
// kernel: tpu_custom_call.1
= control target key start
LH: loop header
LB: loop body
LE: loop exit
PB: predicated region body
PF: predicated region fallthrough
CT: control target
= control target key end

     0   :  { %8 = vsyncpa [#allocation4], 0  ;;  %s1345_s0 = inlined_call_operand.hbm [shape: bf16[8,1024], index: 0, kind: input, shape index: {}]   ;;  %s1346_s1 = inlined_call_operand.hbm [shape: bf16[1024,128], index: 1, kind: input, shape index: {}]   ;;  %s1347_s2 = inlined_call_operand.vmem [shape: f32[1,128], index: 2, kind: input, shape index: {}]   ;;  %s1348_s3 = inlined_call_operand.hbm [shape: f32[8,128], index: 3, kind: output, shape index: {}]  }
   0x1   :  { %10 = vsyncpa [#allocation4 + $0x1], 0 }
   0x2   :  { %11 = vsyncpa [#allocation7], 0 }
   0x3   :  { %13 = vsyncpa [#allocation7 + $0x1], 0 }
   0x4   :  { %14 = vsyncpa [#allocation5], 0  ;;  %s1103_s12 = smov 0   ;;  %s1105_s13 = smov 0  }
   0x5   :  { %s1107_s14 = smov 0   ;;  %s1109_s15 = smov 0  }
   0x6   :  { %s1111_s16 = smov 0   ;;  %s1113_s17 = smov 0  }
   0x7 LB: > { %s722_s18 = sadd.s32 4294967295, %s1076_s17   ;;  %s29_s19 = sadd.s32 1, %s1072_s16  ;;  %s1076_s17 = sphi %s1113_s17, %s20_s17   ;;  %s1072_s16 = sphi %s1111_s16, %s1362_s16   ;;  %s1068_s15 = sphi %s1109_s15, %s1361_s15   ;;  %s1064_s14 = sphi %s1107_s14, %s1360_s14   ;;  %s1060_s13 = sphi %s1105_s13, %s1359_s13   ;;  %s1056_s12 = sphi %s1103_s12, %s1358_s12  }
   0x8   : > { %p30_p0 = scmp.ge.s32.totalorder %s29_s19, 2  ;;  %s41_s20 = sadd.s32 1, %s1064_s14 }
   0x9   : > { %p48_p1 = scmp.ne.s32.totalorder %s1064_s14, %s1060_s13  ;;  %p49_p2 = scmp.eq.s32.totalorder %s1076_s17, 0 }
   0xa   : > { %s1364_s19 = smov (%p30_p0, %s29_s19), 0  ;;  %p54_p4 = scmp.ne.s32.totalorder %s1060_s13, %s1056_s12 }
   0xb   : > { %p1139_p3 = por %p49_p2, %p48_p1  ;;  %s37_s22 = ssub.s32 %s1072_s16, %s1364_s19 }
   0xc   : > { %p55_p5 = scmp.eq.s32.totalorder %s722_s18, 0  ;;  %p39_p6 = scmp.eq.s32.totalorder %s37_s22, 0 }
   0xd   : > { %p838_p8 = scmp.lt.s32.totalorder %s1076_s17, 2  ;;  %s1157_s25 = sand.u32 1, %s1064_s14  }
   0xe   : > { %p1148_p7 = por %p55_p5, %p54_p4  ;;  %s777_s26 = sshll.u32 %s1072_s16, 8 }
   0xf   : > { %s1154_s24 = scalar_select %p39_p6, %s1064_s14, %s41_s20  }
  0x10   : > { %s1351_s23 = scalar_select %p1148_p7, 1, 0 }
  0x11   : > { %s725_s27 = sshll.u32 %s1157_s25, 4  ;;  %s1164_s30 = scalar_lea.hbm %s1345_s0, %s777_s26 }
  0x12   : > { %s158_s4 = scalar_lea.vmem [#allocation3], %s725_s27  ;;  %p1168_p9 = pnand %p838_p8, %p1139_p3 }
  0x13   : > { %s168_s5 = sshll.u32 %s158_s4, 4  ;;  %s155_s7 = scalar_lea.sflag [#allocation4], %s1157_s25  ;;  %s1172_s5 = int_to_ptr.vmem [resolvable:$true] %s168_s5 }
  0x14   : > { %s932_s8 = scalar_lea.hbm %s1164_s30, 256  ;;  %p934_p13 = pneg %p1168_p9 }
  0x15   : > { %p933_p12 = scmp.ne.s32.totalorder %s1164_s30, %s932_s8  ;;  %s937_s11 = scalar_lea.hbm %s1345_s0, 512 }
  0x16   : > { %p938_p2 = scmp.lt.u32.totalorder %s1164_s30, %s1345_s0  ;;  %p939_p3 = scmp.lt.u32.totalorder %s937_s11, %s932_s8 }
  0x17   : > { %p935_p0 = pnand %p934_p13, %p933_p12  ;;  %p941_p5 = scmp.lt.u32.totalorder %s932_s8, %s1164_s30 }
  0x18   : > { %p940_p4 = por %p939_p3, %p938_p2 }
  0x19   : > { %p936_p1 = pneg %p935_p0 }
  0x1a   : > { %p942_p6 = por %p941_p5, %p940_p4 }
  0x1c   : > { %p943_p8 = pnand %p942_p6, %p936_p1 }
  0x1e   : > { %946 = shalt.err (!%p943_p8)
}
  0x1f   : > { %s947_s21 = scalar_lea.vmem %s1172_s5, 256  ;;  %s1078_s22 = smov [#allocation3]  }
  0x20   : > { %p948_p12 = scmp.ne.s32.totalorder %s1172_s5, %s947_s21  ;;  %s952_s26 = sshll.u32 %s1078_s22, 4  ;;  %s953_s26 = int_to_ptr.vmem [resolvable:$false] %s952_s26 }
  0x21   : > { %s954_s27 = scalar_lea.vmem %s953_s26, 512  ;;  %p955_p11 = scmp.lt.s32.totalorder %s1172_s5, %s953_s26 }
  0x22   : > { %p950_p0 = pnand %p948_p12, %p934_p13  ;;  %p956_p2 = scmp.lt.s32.totalorder %s954_s27, %s947_s21 }
  0x24   : > { %p951_p10 = pneg %p950_p0  ;;  %p957_p3 = por %p956_p2, %p955_p11 }
  0x26   : > { %p958_p4 = pnand %p957_p3, %p951_p10 }
  0x28   : > { %961 = shalt.err (!%p958_p4)
}
  0x29   : > { %834 = dma.hbm_to_vmem [thread:$0]  (!%p1168_p9), %s1164_s30, 256, %s1172_s5, %s155_s7  }
  0x2a   : > { %p1353_p1 = scmp.lt.s32.totalorder %s1076_s17, 3  ;;  %p1354_p5 = scmp.ge.s32.totalorder %s1076_s17, 1 }
  0x2b   : > { %s728_s29 = sshll.u32 %s1157_s25, 8  ;;  %s778_s4 = sshll.u32 %s1072_s16, 12 }
  0x2c   : > { %p1206_p6 = pnand %p1354_p5, %p1353_p1  ;;  %s1215_s10 = scalar_lea.hbm %s1346_s1, %s778_s4 }
  0x2d   : > { %s179_s11 = scalar_lea.vmem [#allocation6], %s728_s29  ;;  %s176_s30 = scalar_lea.sflag [#allocation7], %s1157_s25 }
  0x2e   : > { %s186_s12 = sshll.u32 %s179_s11, 4  ;;  %s962_s5 = scalar_lea.hbm %s1215_s10, 4096  ;;  %s1217_s12 = int_to_ptr.vmem [resolvable:$true] %s186_s12 }
  0x2f   : > { %p963_p10 = scmp.ne.s32.totalorder %s1215_s10, %s962_s5  ;;  %s967_s21 = scalar_lea.hbm %s1346_s1, 8192 }
  0x30   : > { %p968_p12 = scmp.lt.u32.totalorder %s1215_s10, %s1346_s1  ;;  %p969_p0 = scmp.lt.u32.totalorder %s967_s21, %s962_s5 }
  0x31   : > { %p965_p11 = pnand %p963_p10, %p934_p13  ;;  %p971_p3 = scmp.lt.u32.totalorder %s962_s5, %s1215_s10 }
  0x32   : > { %p970_p2 = por %p969_p0, %p968_p12 }
  0x33   : > { %p966_p8 = pneg %p965_p11 }
  0x34   : > { %p972_p4 = por %p971_p3, %p970_p2 }
  0x36   : > { %p973_p1 = pnand %p972_p4, %p966_p8 }
  0x38   : > { %976 = shalt.err (!%p973_p1)
}
  0x39   : > { %s977_s27 = scalar_lea.vmem %s1217_s12, 4096  ;;  %s1079_s29 = smov [#allocation6]  }
  0x3a   : > { %p978_p5 = scmp.ne.s32.totalorder %s1217_s12, %s977_s27  ;;  %s982_s4 = sshll.u32 %s1079_s29, 4  ;;  %s983_s4 = int_to_ptr.vmem [resolvable:$false] %s982_s4 }
  0x3b   : > { %s984_s8 = scalar_lea.vmem %s983_s4, 8192  ;;  %p985_p7 = scmp.lt.s32.totalorder %s1217_s12, %s983_s4 }
  0x3c   : > { %p980_p10 = pnand %p978_p5, %p934_p13  ;;  %p986_p12 = scmp.lt.s32.totalorder %s984_s8, %s977_s27 }
  0x3e   : > { %p981_p11 = pneg %p980_p10  ;;  %p987_p0 = por %p986_p12, %p985_p7 }
  0x40   : > { %p988_p2 = pnand %p987_p0, %p981_p11 }
  0x42   : > { %991 = shalt.err (!%p988_p2)
}
  0x43   : > { %s1080_s9 = smov 64   ;;  %s1081_s11 = smov 4  }
  0x44   : > { %837 = dma.hbm_to_vmem [thread:$0]  (!%p1168_p9), %s1215_s10, 4096, %s1217_s12, %s176_s30, %s1080_s9, %s1080_s9, %s1081_s11  }
  0x45   : > { %198 = sbr.rel (%p1206_p6) target bundleno = 692 (0x2b4), region = 32  ;;  %s200_s5 = sand.u32 (!%p1206_p6), 1, %s1060_s13  }
  0x46   : > { %s732_s7 = sshll.u32 (!%p1206_p6), %s200_s5, 4  ;;  %s201_s20 = scalar_lea.sflag (!%p1206_p6), [#allocation4], %s200_s5 }
  0x47   : > { %s1248_s21 = scalar_lea.vmem (!%p1206_p6), [#allocation3], %s732_s7  ;;  %p1356_p7 = scmp.ne.s32.totalorder (!%p1206_p6), %s1351_s23, 0 }
  0x4c   : > { %1043 = dma.done.wait (%p1356_p7), %s201_s20, 256  }
  0x4d   : > { %1045 = vsyncadd (%p1356_p7), %s201_s20, 4294967040  ;;  %s733_s22 = sshll.u32 %s200_s5, 8  ;;  %s210_s6 = scalar_lea.sflag [#allocation7], %s200_s5 }
  0x4e   : > { %s1254_s25 = scalar_lea.vmem [#allocation6], %s733_s22 }
  0x4f   : > { %1047 = dma.done.wait (%p1356_p7), %s210_s6, 4096  }
  0x50   : > { %1049 = vsyncadd (%p1356_p7), %s210_s6, 4294963200  ;;  %p734_p9 = scmp.ne.s32.totalorder %s1068_s15, 0 }
  0x51   : > { %v735_v0 = vld [vmem:[%s1347_s2] ss:$0 sm:$0xff] (!%p734_p9) }
  0x52   : > { %242 = sbr.rel (%p734_p9) target bundleno = 89 (0x59), region = 44  ;;  %250 = vst [vmem:[#allocation2] sm:$0xff] (!%p734_p9), %v735_v0 }
  0x59 PF: > { %v892_v1 = vld [vmem:[%s1254_s25 + $0x40] sm:$0xff]   ;;  %v896_v5 = vld [vmem:[%s1254_s25 + $0x48] sm:$0xff]   ;;  %v900_v9 = vld [vmem:[%s1254_s25 + $0x50] sm:$0xff]   ;;  %p772_p13 = scmp.ne.s32.totalorder %s1068_s15, 1 }
  0x5a   : > { %v893_v2 = vld [vmem:[%s1254_s25 + $0xc0] sm:$0xff]   ;;  %779 = vmatprep.subr.bf16.mxu0 %v892_v1  ;;  %v897_v6 = vld [vmem:[%s1254_s25 + $0xc8] sm:$0xff]   ;;  %v901_v10 = vld [vmem:[%s1254_s25 + $0xd0] sm:$0xff]   ;;  %v611_v52 = vlaneseq (!%p772_p13) }
  0x5b   : > { %v894_v3 = vld [vmem:[%s1254_s25] sm:$0xff]   ;;  %801 = vmatprep.subr.bf16.mxu1 %v893_v2  ;;  %v898_v7 = vld [vmem:[%s1254_s25 + $0x8] sm:$0xff]   ;;  %v902_v11 = vld [vmem:[%s1254_s25 + $0x10] sm:$0xff]  }
  0x5c   : > { %v895_v4 = vld [vmem:[%s1254_s25 + $0x80] sm:$0xff]   ;;  %780 = vmatpush3.bf16.msra.mxu0 %v894_v3  ;;  %v899_v8 = vld [vmem:[%s1254_s25 + $0x88] sm:$0xff]   ;;  %v903_v12 = vld [vmem:[%s1254_s25 + $0x90] sm:$0xff]   ;;  %v612_v54 = vand.u32 (!%p772_p13), 127, %v611_v52 }
  0x5d   : > { %802 = vmatpush3.bf16.msra.mxu1 %v895_v4  ;;  %781 = vmatprep.subr.bf16.mxu0 %v896_v5  ;;  %v904_v13 = vld [vmem:[%s1254_s25 + $0x58] sm:$0xff]   ;;  %v908_v17 = vld [vmem:[%s1254_s25 + $0x60] sm:$0xff]   ;;  %v912_v21 = vld [vmem:[%s1254_s25 + $0x68] sm:$0xff]  }
  0x5e   : > { %803 = vmatprep.subr.bf16.mxu1 %v897_v6  ;;  %v905_v14 = vld [vmem:[%s1254_s25 + $0xd8] sm:$0xff]   ;;  %v909_v18 = vld [vmem:[%s1254_s25 + $0xe0] sm:$0xff]   ;;  %v913_v22 = vld [vmem:[%s1254_s25 + $0xe8] sm:$0xff]   ;;  %vm613_vm0 = vcmp.lt.s32.totalorder (!%p772_p13), %v612_v54, 32 }
  0x5f   : > { %v906_v15 = vld [vmem:[%s1254_s25 + $0x18] sm:$0xff]   ;;  %v910_v19 = vld [vmem:[%s1254_s25 + $0x20] sm:$0xff]   ;;  %v914_v23 = vld [vmem:[%s1254_s25 + $0x28] sm:$0xff]  }
  0x60   : > { %782 = vmatpush3.bf16.msra.mxu0 %v898_v7  ;;  %v907_v16 = vld [vmem:[%s1254_s25 + $0x98] sm:$0xff]   ;;  %v911_v20 = vld [vmem:[%s1254_s25 + $0xa0] sm:$0xff]   ;;  %v915_v24 = vld [vmem:[%s1254_s25 + $0xa8] sm:$0xff]  }
  0x61   : > { %804 = vmatpush3.bf16.msra.mxu1 %v899_v8  ;;  %783 = vmatprep.subr.bf16.mxu0 %v900_v9  ;;  %v916_v25 = vld [vmem:[%s1254_s25 + $0x70] sm:$0xff]   ;;  %v920_v29 = vld [vmem:[%s1254_s25 + $0x78] sm:$0xff]  }
  0x62   : > { %805 = vmatprep.subr.bf16.mxu1 %v901_v10  ;;  %v917_v26 = vld [vmem:[%s1254_s25 + $0xf0] sm:$0xff]   ;;  %v921_v30 = vld [vmem:[%s1254_s25 + $0xf8] sm:$0xff]  }
  0x63   : > { %v918_v27 = vld [vmem:[%s1254_s25 + $0x30] sm:$0xff]   ;;  %v922_v31 = vld [vmem:[%s1254_s25 + $0x38] sm:$0xff]  }
  0x64   : > { %784 = vmatpush3.bf16.msra.mxu0 %v902_v11  ;;  %v919_v28 = vld [vmem:[%s1254_s25 + $0xb0] sm:$0xff]   ;;  %v923_v32 = vld [vmem:[%s1254_s25 + $0xb8] sm:$0xff]  }
  0x65   : > { %806 = vmatpush3.bf16.msra.mxu1 %v903_v12  ;;  %785 = vmatprep.subr.bf16.mxu0 %v904_v13  ;;  %v252_v33 = vld [vmem:[%s1248_s21] sm:$0xff]  ;;  %v253_v34 = vld [vmem:[%s1248_s21 + $0x8] sm:$0xff] }
  0x66   : > { %807 = vmatprep.subr.bf16.mxu1 %v905_v14  ;;  %v736_v35 = vcombine.low %v252_v33, %v252_v33  ;;  %v737_v36 = vcombine.high %v252_v33, %v252_v33  ;;  %v738_v37 = vcombine.low %v253_v34, %v253_v34  ;;  %v739_v38 = vcombine.high %v253_v34, %v253_v34  ;;  %v251_v47 = vld [vmem:[#allocation2] sm:$0xff] }
  0x68   : > { %786 = vmatpush3.bf16.msra.mxu0 %v906_v15  ;;  %556 = vmatprep.mubr.bf16.mxu0 %v737_v36 }
  0x69   : > { %808 = vmatpush3.bf16.msra.mxu1 %v907_v16  ;;  %787 = vmatprep.subr.bf16.mxu0 %v908_v17 }
  0x6a   : > { %809 = vmatprep.subr.bf16.mxu1 %v909_v18  ;;  %596 = vmatprep.mubr.bf16.mxu1 %v739_v38 }
  0x6c   : > { %788 = vmatpush3.bf16.msra.mxu0 %v910_v19 }
  0x6d   : > { %810 = vmatpush3.bf16.msra.mxu1 %v911_v20  ;;  %789 = vmatprep.subr.bf16.mxu0 %v912_v21 }
  0x6e   : > { %811 = vmatprep.subr.bf16.mxu1 %v913_v22 }
  0x70   : > { %790 = vmatpush3.bf16.msra.mxu0 %v914_v23 }
  0x71   : > { %812 = vmatpush3.bf16.msra.mxu1 %v915_v24  ;;  %791 = vmatprep.subr.bf16.mxu0 %v916_v25 }
  0x72   : > { %813 = vmatprep.subr.bf16.mxu1 %v917_v26 }
  0x74   : > { %792 = vmatpush3.bf16.msra.mxu0 %v918_v27 }
  0x75   : > { %814 = vmatpush3.bf16.msra.mxu1 %v919_v28  ;;  %793 = vmatprep.subr.bf16.mxu0 %v920_v29 }
  0x76   : > { %815 = vmatprep.subr.bf16.mxu1 %v921_v30 }
  0x78   : > { %794 = vmatpush3.bf16.msra.mxu0 %v922_v31 }
  0x79   : > { %816 = vmatpush3.bf16.msra.mxu1 %v923_v32 }
  0x7b   : > { %557 = vmatmul.mubr.bf16.vlgmr.msra.gmra.mrb[0].mxu0 %v736_v35 }
  0x7c   : > { %597 = vmatmul.mubr.bf16.vlgmr.msra.gmra.mrb[0].mxu1 %v738_v37 }
 0x14e   : > { %v795_v39 = vpop.f32.mrb[0].mxu0 }
 0x14f   : > { %v817_v40 = vpop.f32.mrb[0].mxu1  ;;  %v796_v41 = vpop.f32.mrb[1].mxu0 }
 0x150   : > { %v818_v42 = vpop.f32.mrb[1].mxu1  ;;  %v797_v43 = vadd.f32 %v796_v41, %v795_v39  ;;  %v798_v45 = vpop.f32.mrb[2].mxu0 }
 0x151   : > { %v819_v44 = vadd.f32 %v818_v42, %v817_v40  ;;  %v820_v46 = vpop.f32.mrb[2].mxu1  ;;  %v799_v48 = vpop.f32.mrb[3].mxu0  ;;  %609 = sbr.rel (%p772_p13) target bundleno = 667 (0x29b), region = 48 }
 0x152   : > { %v821_v49 = vpop.f32.mrb[3].mxu1 }
 0x153   : > { %v599_v50 = vadd.f32 %v819_v44, %v797_v43 }
 0x155   : > { %v604_v51 = vadd.f32 %v599_v50, %v251_v47 }
 0x157   : > { %605 = vst [vmem:[#allocation2] sm:$0xff] %v604_v51 }
 0x15e   : > { %v610_v53 = vld [vmem:[#allocation2] sm:$0xff] }
 0x15f   : > { %v614_v55 = vsel %vm613_vm0, %v610_v53, -inf }
 0x160   : > { %615 = vmax.xlane.f32.xlu0 %v614_v55 }
 0x1ed   : > { %v616_v56 = vpop.xlane.xlu0 %615 }
 0x1ee   : > { %v617_v57 = vsub.f32 %v614_v55, %v616_v56 }
 0x1f0   : > { %v618_v58 = vmul.f32 1.442695, %v617_v57 }
 0x1f2   : > { %928 = vpow2.f32 %v618_v58 }
 0x1fc   : > { %v929_v59 = vpop.eup %928 }
 0x1fd   : > { %620 = vadd.xlane.f32.xlu0 %v929_v59 }
 0x28a   : > { %v621_v60 = vpop.xlane.xlu0 %620 }
 0x28b   : > { %930 = vlog2.f32 %v621_v60 }
 0x295   : > { %v931_v61 = vpop.eup %930 }
 0x296   : > { %v623_v62 = vmul.f32 0.6931472, %v931_v61 }
 0x298   : > { %v624_v63 = vsub.f32 %v617_v57, %v623_v62 }
 0x29a   : > { %625 = vst [vmem:[#allocation8] sm:$0xff] %v624_v63 }
 0x29b PF: > { %p1301_p6 = scmp.eq.s32.totalorder %s722_s18, 1  ;;  %s1082_s23 = smov [#allocation8]  }
 0x29c   : > { %s635_s12 = sshll.u32 %s1082_s23, 4  ;;  %s636_s12 = int_to_ptr.vmem [resolvable:$true] %s635_s12 }
 0x29d   : > { %s992_s30 = scalar_lea.vmem %s636_s12, 128  ;;  %p999_p1 = scmp.lt.s32.totalorder %s636_s12, %s636_s12 }
 0x29e   : > { %p993_p8 = scmp.ne.s32.totalorder %s636_s12, %s992_s30  ;;  %p1000_p5 = scmp.lt.s32.totalorder %s992_s30, %s992_s30 }
 0x2a0   : > { %p994_p3 = pnand %p993_p8, %p1301_p6  ;;  %p1001_p10 = por %p1000_p5, %p999_p1 }
 0x2a2   : > { %p995_p4 = pneg %p994_p3 }
 0x2a4   : > { %p1002_p11 = pnand %p1001_p10, %p995_p4 }
 0x2a6   : > { %1005 = shalt.err (!%p1002_p11)
}
 0x2a7   : > { %s1006_s18 = scalar_lea.hbm %s1348_s3, 128 }
 0x2a8   : > { %p1007_p12 = scmp.ne.s32.totalorder %s1348_s3, %s1006_s18  ;;  %p1012_p7 = scmp.lt.u32.totalorder %s1006_s18, %s1348_s3 }
 0x2aa   : > { %p1008_p0 = pnand %p1007_p12, %p1301_p6 }
 0x2ac   : > { %p1009_p2 = pneg %p1008_p0 }
 0x2ae   : > { %p1014_p9 = pnand %p1012_p7, %p1009_p2 }
 0x2b0   : > { %1017 = shalt.err (!%p1014_p9)
}
 0x2b1   : > { %828 = dma.vmem_to_hbm [thread:$0]  (%p1301_p6), %s636_s12, 128, %s1348_s3, [#allocation5]  }
 0x2b2   : > { %1051 = dma.done.wait (%p1301_p6), [#allocation5], 128  }
 0x2b3   : > { %1053 = vsyncadd (%p1301_p6), [#allocation5], 4294967168 }
 0x2b4 PF: > { %s20_s17 = sadd.s32 1, %s1076_s17   ;;  %s1358_s12 = smov %s1060_s13 }
 0x2b5   : > { %p17_p13 = scmp.ge.s32.totalorder %s20_s17, 4   ;;  %s1359_s13 = smov %s1064_s14 }
 0x2b6   : > { %s1360_s14 = smov %s1154_s24  ;;  %s1361_s15 = smov %s1072_s16 }
 0x2b7   : > { %s1362_s16 = smov %s1364_s19  ;;  %19 = sbr.rel (!%p17_p13) target bundleno = 7 (0x7), region = 91 }
 0x2be   :  { %648 = vsyncpa [#allocation4], 1 }
 0x2bf   :  { %650 = vsyncpa [#allocation4 + $0x1], 1 }
 0x2c0   :  { %651 = vsyncpa [#allocation7], 1 }
 0x2c1   :  { %653 = vsyncpa [#allocation7 + $0x1], 1 }
 0x2c2   :  { %654 = vsyncpa [#allocation5], 1 }
 0x2c3   :  { %656 = vsyncpa [#allocation5 + $0x1], 1 }

</bundles_post_ra>
